<compile_context>
chip_gen: v7x
topology: tpu7x:2x2x1
jax: 0.10.0
libtpu: 0.0.40
codegen_flags: <defaults>
</compile_context>

<pallas_src>
import functools

import jax
import jax.numpy as jnp
from jax.experimental import pallas as pl
from jax.experimental.pallas import tpu as pltpu

LANE = 128
SUBLANE = 8
MATMUL_DTYPE = jnp.bfloat16  # MXU peak is bf16 on v5e/v6e/v7x


def _round_up(x, m):
    return ((x + m - 1) // m) * m


# -----------------------------------------------------------------------------
# Kernel
# -----------------------------------------------------------------------------
def _mlp_kernel(*refs, n_x, matmul_dtype):
    """refs = x_0..x_{n_x-1}, w1_0..w1_{n_x-1}, b1, w2, b2, w3, b3, out."""
    x_refs = refs[:n_x]
    w1_refs = refs[n_x:2 * n_x]
    b1_ref, w2_ref, b2_ref, w3_ref, b3_ref, o_ref = refs[2 * n_x:]

    # Layer 1: concat fused as a sum of partial matmuls (when n_x > 1):
    #   cat(x0, x1) @ w1 == x0 @ w1[:D0] + x1 @ w1[D0:]
    h = jnp.dot(x_refs[0][...].astype(matmul_dtype), w1_refs[0][...],
                preferred_element_type=jnp.float32)
    for x_ref, w_ref in zip(x_refs[1:], w1_refs[1:]):
        h = h + jnp.dot(x_ref[...].astype(matmul_dtype), w_ref[...],
                        preferred_element_type=jnp.float32)
    h = jnp.maximum(h + b1_ref[...], 0.0)          # bias + ReLU in f32

    # Layer 2: linear -> ReLU
    h = jnp.dot(h.astype(matmul_dtype), w2_ref[...],
                preferred_element_type=jnp.float32)
    h = jnp.maximum(h + b2_ref[...], 0.0)

    # Layer 3: linear (no activation after the last layer)
    h = jnp.dot(h.astype(matmul_dtype), w3_ref[...],
                preferred_element_type=jnp.float32)
    o_ref[...] = (h + b3_ref[...]).astype(o_ref.dtype)


# -----------------------------------------------------------------------------
# Parameter handling (one-time, hoisted out of the forward path)
# -----------------------------------------------------------------------------
def init_params(key, input_dims, dimensions, output_dim):
    """nn.Linear-style uniform(-1/sqrt(fan_in), 1/sqrt(fan_in)) init.
    Weights stored as [in, out] (y = x @ W + b); biases (1, out)."""
    dims = [sum(input_dims)] + list(dimensions) + [output_dim]
    params = {}
    for i, (din, dout) in enumerate(zip(dims[:-1], dims[1:]), start=1):
        key, kw, kb = jax.random.split(key, 3)
        bound = 1.0 / (din ** 0.5)
        params[f"w{i}"] = jax.random.uniform(
            kw, (din, dout), jnp.float32, -bound, bound)
        params[f"b{i}"] = jax.random.uniform(
            kb, (1, dout), jnp.float32, -bound, bound)
    return params


def prepare_params(params, input_dims, *, matmul_dtype=MATMUL_DTYPE):
    """One-time prep: split w1 per input (concat fusion), zero-pad hidden dims
    to lane width (exact for linear+ReLU), cast matmul weights to bf16.
    Keeps per-forward XLA slice/pad/cast passes off the hot path."""
    w1, b1 = params["w1"], params["b1"]
    w2, b2 = params["w2"], params["b2"]
    w3, b3 = params["w3"], params["b3"]
    H1, H2, DO = w1.shape[1], w2.shape[1], w3.shape[1]
    H1p, H2p = _round_up(H1, LANE), _round_up(H2, LANE)

    # Fusing the concat only pays when the concatenated width is large; for
    # tiny inputs a single lane-dense matmul beats several K<<128 MXU passes.
    fuse_concat = sum(input_dims) > LANE
    if fuse_concat:
        parts, off = [], 0
        for d in input_dims:
            parts.append(w1[off:off + d])
            off += d
    else:
        parts = [w1]
    w1_parts = tuple(
        jnp.pad(w, ((0, 0), (0, H1p - H1))).astype(matmul_dtype) for w in parts)

    return {
        "w1_parts": w1_parts,
        "b1": jnp.pad(b1, ((0, 0), (0, H1p - H1))).astype(jnp.float32),
        "w2": jnp.pad(w2, ((0, H1p - H1), (0, H2p - H2))).astype(matmul_dtype),
        "b2": jnp.pad(b2, ((0, 0), (0, H2p - H2))).astype(jnp.float32),
        "w3": jnp.pad(w3, ((0, H2p - H2), (0, 0))).astype(matmul_dtype),
        "b3": b3.astype(jnp.float32),
        "fuse_concat": fuse_concat,
        "input_dims": tuple(input_dims),
        "out_dim": DO,
        "matmul_dtype": matmul_dtype,
    }


def _choose_tb(B, block_b):
    """Pick a batch tile that (a) divides B if at all possible (no pad/slice
    HBM round trip), (b) leaves >=2 grid steps for v7x megacore sharding."""
    cap = min(block_b, max(B, SUBLANE))
    if B >= 2 * SUBLANE:
        cap = min(cap, _round_up((B + 1) // 2, SUBLANE))
    cap = max(SUBLANE, (cap // SUBLANE) * SUBLANE)
    if B % SUBLANE == 0:
        tb = cap
        while tb >= SUBLANE:
            if B % tb == 0:
                return tb, B           # divides: no batch padding needed
            tb -= SUBLANE
    return cap, _round_up(B, cap)      # fallback: pad batch


# -----------------------------------------------------------------------------
# Forward
# -----------------------------------------------------------------------------
def concat_mlp(x_list, prepared, *, block_b=512, single_buffer_weights=True):
    x0, x1 = x_list
    # torch ConcatMLP mixed-rank fixup: unsqueeze(1).reshape_as(other) is a
    # numel-preserving reshape, reproduced exactly here.
    if x0.ndim == 3 and x1.ndim == 2:
        x1 = x1.reshape(x0.shape)
    if x1.ndim == 3 and x0.ndim == 2:
        x0 = x0.reshape(x1.shape)

    lead_shape = x0.shape[:-1]
    xs = [x0.reshape(-1, x0.shape[-1]), x1.reshape(-1, x1.shape[-1])]
    if not prepared["fuse_concat"]:
        # Small total width: one lane-dense layer-1 matmul instead of two.
        xs = [jnp.concatenate(xs, axis=-1)]

    B = xs[0].shape[0]
    DO = prepared["out_dim"]
    H1p = prepared["b1"].shape[1]
    H2p = prepared["b2"].shape[1]
    out_dtype = x0.dtype

    TB, Bp = _choose_tb(B, block_b)
    if Bp != B:
        xs = [jnp.pad(x, ((0, Bp - B), (0, 0))) for x in xs]

    weights = list(prepared["w1_parts"]) + [
        prepared["b1"], prepared["w2"], prepared["b2"],
        prepared["w3"], prepared["b3"]]
    kernel = functools.partial(_mlp_kernel, n_x=len(xs),
                               matmul_dtype=prepared["matmul_dtype"])

    def act_spec(d):
        return pl.BlockSpec((TB, d), lambda i: (i, 0))

    def build_call(single_buffer):
        def res_spec(a):
            # Resident operand: same block every grid step. Buffered(1) halves
            # its VMEM footprint (it is never re-fetched anyway).
            kwargs = {"pipeline_mode": pl.Buffered(1)} if single_buffer else {}
            return pl.BlockSpec(a.shape, lambda i: (0,) * a.ndim, **kwargs)

        # Explicit scoped-VMEM budget derived from the footprint.
        w_bytes = sum(int(w.nbytes) for w in weights)
        n_wbuf = 1 if single_buffer else 2
        act_bytes = 2 * TB * sum(x.shape[-1] for x in xs) * xs[0].dtype.itemsize
        out_bytes = 2 * TB * DO * jnp.dtype(out_dtype).itemsize
        tmp_bytes = TB * (H1p + H2p + DO) * 4          # f32 intermediates
        vmem_limit = min(
            2 * (n_wbuf * w_bytes + act_bytes + out_bytes + tmp_bytes) + (4 << 20),
            64 << 20)  # stay within v7x's 64 MiB/TC physical VMEM

        return pl.pallas_call(
            kernel,
            out_shape=jax.ShapeDtypeStruct((Bp, DO), out_dtype),
            grid_spec=pltpu.PrefetchScalarGridSpec(
                num_scalar_prefetch=0,
                grid=(Bp // TB,),
                in_specs=[act_spec(x.shape[-1]) for x in xs]
                         + [res_spec(w) for w in weights],
                out_specs=pl.BlockSpec((TB, DO), lambda i: (i, 0)),
            ),
            compiler_params=pltpu.CompilerParams(
                dimension_semantics=("parallel",),  # megacore batch sharding on v7x
                vmem_limit_bytes=int(vmem_limit),
            ),
        )

    if single_buffer_weights:
        try:
            out = build_call(True)(*xs, *weights)
            out = jax.block_until_ready(out)
        except Exception:
            # Older JAX may reject pipeline_mode=pl.Buffered(1) on the
            # top-level grid; fall back to default double-buffered weights.
            out = build_call(False)(*xs, *weights)
    else:
        out = build_call(False)(*xs, *weights)

    if Bp != B:
        out = out[:B]
    return out.reshape(lead_shape + (DO,))


# -----------------------------------------------------------------------------
# Pure-JAX reference (f32) for correctness checks
# -----------------------------------------------------------------------------
def concat_mlp_ref(x_list, params):
    x0, x1 = x_list
    if x0.ndim == 3 and x1.ndim == 2:
        x1 = x1.reshape(x0.shape)
    if x1.ndim == 3 and x0.ndim == 2:
        x0 = x0.reshape(x1.shape)
    z = jnp.concatenate([x0, x1], axis=-1)
    h = jnp.maximum(z @ params["w1"] + params["b1"], 0.0)
    h = jnp.maximum(h @ params["w2"] + params["b2"], 0.0)
    return h @ params["w3"] + params["b3"]


if __name__ == "__main__":
    key = jax.random.PRNGKey(0)

    # Case 1: small module-consistent shapes.
    # sum(input_dims)=32 <= 128 -> concat in wrapper, single layer-1 matmul.
    input_dims = [16, 16]
    dimensions = [32, 32]
    output_dim = 32
    batch = 8
    k0, k1, kp, key = jax.random.split(key, 4)
    x0 = jax.random.normal(k0, (batch, input_dims[0]), jnp.float32)
    x1 = jax.random.normal(k1, (batch, input_dims[1]), jnp.float32)
    params = init_params(kp, input_dims, dimensions, output_dim)
    prepared = prepare_params(params, input_dims)

    out = jax.block_until_ready(concat_mlp([x0, x1], prepared))
    ref = concat_mlp_ref([x0, x1], params)
    assert out.shape == (batch, output_dim)
    # bf16 MXU inputs with f32 accumulation -> loosened tolerance vs f32 ref.
    assert jnp.allclose(out, ref, atol=3e-2, rtol=3e-2), \
        float(jnp.max(jnp.abs(out - ref)))

    # Case 2: wider inputs -> concat fused into layer 1 (split w1),
    # multi-step batch grid (TB divides B, no batch padding).
    input_dims = [96, 160]
    dimensions = [128, 128]
    output_dim = 64
    batch = 24
    k0, k1, kp, key = jax.random.split(key, 4)
    x0 = jax.random.normal(k0, (batch, input_dims[0]), jnp.float32)
    x1 = jax.random.normal(k1, (batch, input_dims[1]), jnp.float32)
    params = init_params(kp, input_dims, dimensions, output_dim)
    prepared = prepare_params(params, input_dims)

    out = jax.block_until_ready(concat_mlp([x0, x1], prepared))
    ref = concat_mlp_ref([x0, x1], params)
    assert out.shape == (batch, output_dim)
    assert jnp.allclose(out, ref, atol=3e-2, rtol=3e-2), \
        float(jnp.max(jnp.abs(out - ref)))

    print("KERNEL_OK")
</pallas_src>

<mosaic_0001>
module attributes {stable_mosaic.version = 11 : i64} {
  func.func @_mlp_kernel(%arg0: i32, %arg1: memref<8x32xf32, #tpu.memory_space<vmem>>, %arg2: memref<32x128xbf16, #tpu.memory_space<vmem>>, %arg3: memref<1x128xf32, #tpu.memory_space<vmem>>, %arg4: memref<128x128xbf16, #tpu.memory_space<vmem>>, %arg5: memref<1x128xf32, #tpu.memory_space<vmem>>, %arg6: memref<128x32xbf16, #tpu.memory_space<vmem>>, %arg7: memref<1x32xf32, #tpu.memory_space<vmem>>, %arg8: memref<8x32xf32, #tpu.memory_space<vmem>>) attributes {dimension_semantics = [#tpu.dimension_semantics<parallel>], iteration_bounds = array<i64: 1>, scalar_prefetch = 0 : i64, scratch_operands = 0 : i64, tpu.core_type = #tpu.core_type<tc>, window_params = [{transform_indices = @transform_0, window_bounds = array<i64: 8, 32>}, {pipeline_mode = #tpu.pipeline_mode<synchronous>, transform_indices = @transform_1, window_bounds = array<i64: 32, 128>}, {pipeline_mode = #tpu.pipeline_mode<synchronous>, transform_indices = @transform_2, window_bounds = array<i64: 1, 128>}, {pipeline_mode = #tpu.pipeline_mode<synchronous>, transform_indices = @transform_3, window_bounds = array<i64: 128, 128>}, {pipeline_mode = #tpu.pipeline_mode<synchronous>, transform_indices = @transform_4, window_bounds = array<i64: 1, 128>}, {pipeline_mode = #tpu.pipeline_mode<synchronous>, transform_indices = @transform_5, window_bounds = array<i64: 128, 32>}, {pipeline_mode = #tpu.pipeline_mode<synchronous>, transform_indices = @transform_6, window_bounds = array<i64: 1, 32>}, {transform_indices = @transform_7, window_bounds = array<i64: 8, 32>}]} {
    %c0 = arith.constant 0 : index
    %c0_0 = arith.constant 0 : index
    %0 = vector.load %arg1[%c0, %c0_0] : memref<8x32xf32, #tpu.memory_space<vmem>>, vector<8x32xf32>
    %1 = arith.truncf %0 : vector<8x32xf32> to vector<8x32xbf16>
    %c0_1 = arith.constant 0 : index
    %c0_2 = arith.constant 0 : index
    %2 = vector.load %arg2[%c0_1, %c0_2] : memref<32x128xbf16, #tpu.memory_space<vmem>>, vector<32x128xbf16>
    %cst = arith.constant dense<0.000000e+00> : vector<8x128xf32>
    %3 = tpu.matmul %1, %2, %cst {dimension_numbers = #tpu.dot_dimension_numbers<[1], [0], [0], [1], [0, 0, 1, 1], [], []>} : vector<8x32xbf16>, vector<32x128xbf16>, vector<8x128xf32> -> vector<8x128xf32>
    %c0_3 = arith.constant 0 : index
    %c0_4 = arith.constant 0 : index
    %4 = vector.load %arg3[%c0_3, %c0_4] : memref<1x128xf32, #tpu.memory_space<vmem>>, vector<1x128xf32>
    %5 = vector.broadcast %4 : vector<1x128xf32> to vector<8x128xf32>
    %6 = arith.addf %3, %5 : vector<8x128xf32>
    %cst_5 = arith.constant 0.000000e+00 : f32
    %7 = vector.broadcast %cst_5 : f32 to vector<8x128xf32>
    %8 = arith.maximumf %6, %7 : vector<8x128xf32>
    %9 = arith.truncf %8 : vector<8x128xf32> to vector<8x128xbf16>
    %c0_6 = arith.constant 0 : index
    %c0_7 = arith.constant 0 : index
    %10 = vector.load %arg4[%c0_6, %c0_7] : memref<128x128xbf16, #tpu.memory_space<vmem>>, vector<128x128xbf16>
    %cst_8 = arith.constant dense<0.000000e+00> : vector<8x128xf32>
    %11 = tpu.matmul %9, %10, %cst_8 {dimension_numbers = #tpu.dot_dimension_numbers<[1], [0], [0], [1], [0, 0, 1, 1], [], []>} : vector<8x128xbf16>, vector<128x128xbf16>, vector<8x128xf32> -> vector<8x128xf32>
    %c0_9 = arith.constant 0 : index
    %c0_10 = arith.constant 0 : index
    %12 = vector.load %arg5[%c0_9, %c0_10] : memref<1x128xf32, #tpu.memory_space<vmem>>, vector<1x128xf32>
    %13 = vector.broadcast %12 : vector<1x128xf32> to vector<8x128xf32>
    %14 = arith.addf %11, %13 : vector<8x128xf32>
    %cst_11 = arith.constant 0.000000e+00 : f32
    %15 = vector.broadcast %cst_11 : f32 to vector<8x128xf32>
    %16 = arith.maximumf %14, %15 : vector<8x128xf32>
    %17 = arith.truncf %16 : vector<8x128xf32> to vector<8x128xbf16>
    %c0_12 = arith.constant 0 : index
    %c0_13 = arith.constant 0 : index
    %18 = vector.load %arg6[%c0_12, %c0_13] : memref<128x32xbf16, #tpu.memory_space<vmem>>, vector<128x32xbf16>
    %cst_14 = arith.constant dense<0.000000e+00> : vector<8x32xf32>
    %19 = tpu.matmul %17, %18, %cst_14 {dimension_numbers = #tpu.dot_dimension_numbers<[1], [0], [0], [1], [0, 0, 1, 1], [], []>} : vector<8x128xbf16>, vector<128x32xbf16>, vector<8x32xf32> -> vector<8x32xf32>
    %c0_15 = arith.constant 0 : index
    %c0_16 = arith.constant 0 : index
    %20 = vector.load %arg7[%c0_15, %c0_16] : memref<1x32xf32, #tpu.memory_space<vmem>>, vector<1x32xf32>
    %21 = vector.broadcast %20 : vector<1x32xf32> to vector<8x32xf32>
    %22 = arith.addf %19, %21 : vector<8x32xf32>
    %c0_17 = arith.constant 0 : index
    %c0_18 = arith.constant 0 : index
    %23 = vector.load %arg8[%c0_17, %c0_18] : memref<8x32xf32, #tpu.memory_space<vmem>>, vector<8x32xf32>
    tpu.vector_store %arg8[%c0_17, %c0_18], %22 {strides = array<i32>} : memref<8x32xf32, #tpu.memory_space<vmem>>, vector<8x32xf32>,
    return
  }
  func.func @transform_0(%arg0: i32) -> (i32, i32) {
    %c0_i32 = arith.constant 0 : i32
    %c0_i32_0 = arith.constant 0 : i32
    return %arg0, %c0_i32 : i32, i32
  }
  func.func @transform_1(%arg0: i32) -> (i32, i32) {
    %c0_i32 = arith.constant 0 : i32
    %c0_i32_0 = arith.constant 0 : i32
    %c0_i32_1 = arith.constant 0 : i32
    return %c0_i32, %c0_i32_0 : i32, i32
  }
  func.func @transform_2(%arg0: i32) -> (i32, i32) {
    %c0_i32 = arith.constant 0 : i32
    %c0_i32_0 = arith.constant 0 : i32
    %c0_i32_1 = arith.constant 0 : i32
    return %c0_i32, %c0_i32_0 : i32, i32
  }
  func.func @transform_3(%arg0: i32) -> (i32, i32) {
    %c0_i32 = arith.constant 0 : i32
    %c0_i32_0 = arith.constant 0 : i32
    %c0_i32_1 = arith.constant 0 : i32
    return %c0_i32, %c0_i32_0 : i32, i32
  }
  func.func @transform_4(%arg0: i32) -> (i32, i32) {
    %c0_i32 = arith.constant 0 : i32
    %c0_i32_0 = arith.constant 0 : i32
    %c0_i32_1 = arith.constant 0 : i32
    return %c0_i32, %c0_i32_0 : i32, i32
  }
  func.func @transform_5(%arg0: i32) -> (i32, i32) {
    %c0_i32 = arith.constant 0 : i32
    %c0_i32_0 = arith.constant 0 : i32
    %c0_i32_1 = arith.constant 0 : i32
    return %c0_i32, %c0_i32_0 : i32, i32
  }
  func.func @transform_6(%arg0: i32) -> (i32, i32) {
    %c0_i32 = arith.constant 0 : i32
    %c0_i32_0 = arith.constant 0 : i32
    %c0_i32_1 = arith.constant 0 : i32
    return %c0_i32, %c0_i32_0 : i32, i32
  }
  func.func @transform_7(%arg0: i32) -> (i32, i32) {
    %c0_i32 = arith.constant 0 : i32
    %c0_i32_0 = arith.constant 0 : i32
    return %arg0, %c0_i32 : i32, i32
  }
}

module attributes {stable_mosaic.version = 11 : i64} {
  func.func @_mlp_kernel(%arg0: i32, %arg1: memref<8x32xf32, #tpu.memory_space<vmem>>, %arg2: memref<32x128xbf16, #tpu.memory_space<vmem>>, %arg3: memref<1x128xf32, #tpu.memory_space<vmem>>, %arg4: memref<128x128xbf16, #tpu.memory_space<vmem>>, %arg5: memref<1x128xf32, #tpu.memory_space<vmem>>, %arg6: memref<128x32xbf16, #tpu.memory_space<vmem>>, %arg7: memref<1x32xf32, #tpu.memory_space<vmem>>, %arg8: memref<8x32xf32, #tpu.memory_space<vmem>>) attributes {dimension_semantics = [#tpu.dimension_semantics<parallel>], iteration_bounds = array<i64: 1>, scalar_prefetch = 0 : i64, scratch_operands = 0 : i64, tpu.core_type = #tpu.core_type<tc>, window_params = [{transform_indices = @transform_0, window_bounds = array<i64: 8, 32>}, {pipeline_mode = #tpu.pipeline_mode<synchronous>, transform_indices = @transform_1, window_bounds = array<i64: 32, 128>}, {pipeline_mode = #tpu.pipeline_mode<synchronous>, transform_indices = @transform_2, window_bounds = array<i64: 1, 128>}, {pipeline_mode = #tpu.pipeline_mode<synchronous>, transform_indices = @transform_3, window_bounds = array<i64: 128, 128>}, {pipeline_mode = #tpu.pipeline_mode<synchronous>, transform_indices = @transform_4, window_bounds = array<i64: 1, 128>}, {pipeline_mode = #tpu.pipeline_mode<synchronous>, transform_indices = @transform_5, window_bounds = array<i64: 128, 32>}, {pipeline_mode = #tpu.pipeline_mode<synchronous>, transform_indices = @transform_6, window_bounds = array<i64: 1, 32>}, {transform_indices = @transform_7, window_bounds = array<i64: 8, 32>}]} {
    %c0 = arith.constant 0 : index
    %c0_0 = arith.constant 0 : index
    %0 = vector.load %arg1[%c0, %c0_0] : memref<8x32xf32, #tpu.memory_space<vmem>>, vector<8x32xf32>
    %1 = arith.truncf %0 : vector<8x32xf32> to vector<8x32xbf16>
    %c0_1 = arith.constant 0 : index
    %c0_2 = arith.constant 0 : index
    %2 = vector.load %arg2[%c0_1, %c0_2] : memref<32x128xbf16, #tpu.memory_space<vmem>>, vector<32x128xbf16>
    %cst = arith.constant dense<0.000000e+00> : vector<8x128xf32>
    %3 = tpu.matmul %1, %2, %cst {dimension_numbers = #tpu.dot_dimension_numbers<[1], [0], [0], [1], [0, 0, 1, 1], [], []>} : vector<8x32xbf16>, vector<32x128xbf16>, vector<8x128xf32> -> vector<8x128xf32>
    %c0_3 = arith.constant 0 : index
    %c0_4 = arith.constant 0 : index
    %4 = vector.load %arg3[%c0_3, %c0_4] : memref<1x128xf32, #tpu.memory_space<vmem>>, vector<1x128xf32>
    %5 = vector.broadcast %4 : vector<1x128xf32> to vector<8x128xf32>
    %6 = arith.addf %3, %5 : vector<8x128xf32>
    %cst_5 = arith.constant 0.000000e+00 : f32
    %7 = vector.broadcast %cst_5 : f32 to vector<8x128xf32>
    %8 = arith.maximumf %6, %7 : vector<8x128xf32>
    %9 = arith.truncf %8 : vector<8x128xf32> to vector<8x128xbf16>
    %c0_6 = arith.constant 0 : index
    %c0_7 = arith.constant 0 : index
    %10 = vector.load %arg4[%c0_6, %c0_7] : memref<128x128xbf16, #tpu.memory_space<vmem>>, vector<128x128xbf16>
    %cst_8 = arith.constant dense<0.000000e+00> : vector<8x128xf32>
    %11 = tpu.matmul %9, %10, %cst_8 {dimension_numbers = #tpu.dot_dimension_numbers<[1], [0], [0], [1], [0, 0, 1, 1], [], []>} : vector<8x128xbf16>, vector<128x128xbf16>, vector<8x128xf32> -> vector<8x128xf32>
    %c0_9 = arith.constant 0 : index
    %c0_10 = arith.constant 0 : index
    %12 = vector.load %arg5[%c0_9, %c0_10] : memref<1x128xf32, #tpu.memory_space<vmem>>, vector<1x128xf32>
    %13 = vector.broadcast %12 : vector<1x128xf32> to vector<8x128xf32>
    %14 = arith.addf %11, %13 : vector<8x128xf32>
    %cst_11 = arith.constant 0.000000e+00 : f32
    %15 = vector.broadcast %cst_11 : f32 to vector<8x128xf32>
    %16 = arith.maximumf %14, %15 : vector<8x128xf32>
    %17 = arith.truncf %16 : vector<8x128xf32> to vector<8x128xbf16>
    %c0_12 = arith.constant 0 : index
    %c0_13 = arith.constant 0 : index
    %18 = vector.load %arg6[%c0_12, %c0_13] : memref<128x32xbf16, #tpu.memory_space<vmem>>, vector<128x32xbf16>
    %cst_14 = arith.constant dense<0.000000e+00> : vector<8x32xf32>
    %19 = tpu.matmul %17, %18, %cst_14 {dimension_numbers = #tpu.dot_dimension_numbers<[1], [0], [0], [1], [0, 0, 1, 1], [], []>} : vector<8x128xbf16>, vector<128x32xbf16>, vector<8x32xf32> -> vector<8x32xf32>
    %c0_15 = arith.constant 0 : index
    %c0_16 = arith.constant 0 : index
    %20 = vector.load %arg7[%c0_15, %c0_16] : memref<1x32xf32, #tpu.memory_space<vmem>>, vector<1x32xf32>
    %21 = vector.broadcast %20 : vector<1x32xf32> to vector<8x32xf32>
    %22 = arith.addf %19, %21 : vector<8x32xf32>
    %c0_17 = arith.constant 0 : index
    %c0_18 = arith.constant 0 : index
    %23 = vector.load %arg8[%c0_17, %c0_18] : memref<8x32xf32, #tpu.memory_space<vmem>>, vector<8x32xf32>
    tpu.vector_store %arg8[%c0_17, %c0_18], %22 {strides = array<i32>} : memref<8x32xf32, #tpu.memory_space<vmem>>, vector<8x32xf32>,
    return
  }
  func.func @transform_0(%arg0: i32) -> (i32, i32) {
    %c0_i32 = arith.constant 0 : i32
    %c0_i32_0 = arith.constant 0 : i32
    return %arg0, %c0_i32 : i32, i32
  }
  func.func @transform_1(%arg0: i32) -> (i32, i32) {
    %c0_i32 = arith.constant 0 : i32
    %c0_i32_0 = arith.constant 0 : i32
    %c0_i32_1 = arith.constant 0 : i32
    return %c0_i32, %c0_i32_0 : i32, i32
  }
  func.func @transform_2(%arg0: i32) -> (i32, i32) {
    %c0_i32 = arith.constant 0 : i32
    %c0_i32_0 = arith.constant 0 : i32
    %c0_i32_1 = arith.constant 0 : i32
    return %c0_i32, %c0_i32_0 : i32, i32
  }
  func.func @transform_3(%arg0: i32) -> (i32, i32) {
    %c0_i32 = arith.constant 0 : i32
    %c0_i32_0 = arith.constant 0 : i32
    %c0_i32_1 = arith.constant 0 : i32
    return %c0_i32, %c0_i32_0 : i32, i32
  }
  func.func @transform_4(%arg0: i32) -> (i32, i32) {
    %c0_i32 = arith.constant 0 : i32
    %c0_i32_0 = arith.constant 0 : i32
    %c0_i32_1 = arith.constant 0 : i32
    return %c0_i32, %c0_i32_0 : i32, i32
  }
  func.func @transform_5(%arg0: i32) -> (i32, i32) {
    %c0_i32 = arith.constant 0 : i32
    %c0_i32_0 = arith.constant 0 : i32
    %c0_i32_1 = arith.constant 0 : i32
    return %c0_i32, %c0_i32_0 : i32, i32
  }
  func.func @transform_6(%arg0: i32) -> (i32, i32) {
    %c0_i32 = arith.constant 0 : i32
    %c0_i32_0 = arith.constant 0 : i32
    %c0_i32_1 = arith.constant 0 : i32
    return %c0_i32, %c0_i32_0 : i32, i32
  }
  func.func @transform_7(%arg0: i32) -> (i32, i32) {
    %c0_i32 = arith.constant 0 : i32
    %c0_i32_0 = arith.constant 0 : i32
    return %arg0, %c0_i32 : i32, i32
  }
}

</mosaic_0001>

<bundles_post_ra>
// kernel: tpu_custom_call.1
= control target key start
LH: loop header
LB: loop body
LE: loop exit
PB: predicated region body
PF: predicated region fallthrough
CT: control target
= control target key end

     0   :  { %12 = vsyncpa [#allocation3], 0  ;;  %s669_s0 = inlined_call_operand.hbm [shape: f32[8,32], index: 0, kind: input, shape index: {}]   ;;  %s670_s1 = inlined_call_operand.vmem [shape: bf16[32,128], index: 1, kind: input, shape index: {}]   ;;  %s671_s2 = inlined_call_operand.vmem [shape: f32[1,128], index: 2, kind: input, shape index: {}]   ;;  %s672_s3 = inlined_call_operand.vmem [shape: bf16[128,128], index: 3, kind: input, shape index: {}]   ;;  %s673_s4 = inlined_call_operand.vmem [shape: f32[1,128], index: 4, kind: input, shape index: {}]   ;;  %s674_s5 = inlined_call_operand.vmem [shape: bf16[128,32], index: 5, kind: input, shape index: {}]   ;;  %s675_s6 = inlined_call_operand.vmem [shape: f32[1,32], index: 6, kind: input, shape index: {}]   ;;  %s676_s7 = inlined_call_operand.hbm [shape: f32[8,32], index: 7, kind: output, shape index: {}]  }
   0x1   :  { %13 = vsyncpa [#allocation4], 0  ;;  %s512_s24 = smov [#allocation2]   ;;  %s464_s28 = scalar_lea.hbm %s669_s0, 128 }
   0x2   :  { %s20_s25 = sshll.u32 %s512_s24, 4  ;;  %p465_p0 = scmp.ne.s32.totalorder %s669_s0, %s464_s28  ;;  %s21_s25 = int_to_ptr.vmem [resolvable:$true] %s20_s25 }
   0x3   :  { %p468_p1 = scmp.lt.u32.totalorder %s464_s28, %s669_s0 }
   0x5   :  { %p470_p2 = pnand %p468_p1, %p465_p0 }
   0x7   :  { %473 = shalt.err (!%p470_p2)
}
   0x8   :  { %s474_s10 = scalar_lea.vmem %s21_s25, 128  ;;  %p479_p4 = scmp.lt.s32.totalorder %s21_s25, %s21_s25 }
   0x9   :  { %p475_p3 = scmp.ne.s32.totalorder %s21_s25, %s474_s10  ;;  %p480_p5 = scmp.lt.s32.totalorder %s474_s10, %s474_s10 }
   0xb   :  { %p481_p6 = por %p480_p5, %p479_p4 }
   0xd   :  { %p482_p7 = pnand %p481_p6, %p475_p3 }
   0xf   :  { %485 = shalt.err (!%p482_p7)
}
  0x10   :  { %23 = dma.hbm_to_vmem [thread:$0]  %s669_s0, 128, %s21_s25, [#allocation3]  }
  0x11   :  { %508 = dma.done.wait [#allocation3], 128  }
  0x12   :  { %509 = vsyncadd [#allocation3], 4294967168  ;;  %v513_v0 = vmov 0.0   ;;  %vm514_vm0 = vmmov 0   ;;  %v446_v1 = vld [vmem:[%s670_s1] sm:$0xff]   ;;  %v447_v2 = vld [vmem:[%s670_s1 + $0x8] sm:$0xff]  }
  0x13   :  { %394 = vmatprep.subr.bf16.mxu0 %v513_v0  ;;  %398 = vmatprep.mubr.msk.bf16.mxu0 %vm514_vm0, %v513_v0  ;;  %v40_v3 = vld [vmem:[#allocation2] sm:$0xff]  ;;  %v449_v6 = vld [vmem:[%s672_s3 + $0x8] sm:$0xff]   ;;  %vm65_vm1 = vcmask 261120   ;;  %v450_v7 = vld [vmem:[%s672_s3 + $0x10] sm:$0xff]   ;;  %s515_s26 = smov [#allocation5]  }
  0x14   :  { %402 = vmatprep.subr.bf16.mxu1 %v513_v0  ;;  %418 = vmatprep.mubr.msk.bf16.mxu1 %vm514_vm0, %v513_v0  ;;  %v448_v4 = vld [vmem:[%s672_s3] sm:$0xff]   ;;  %v41_v5 = vpack.c.bf16 %v40_v3, %v40_v3  ;;  %v451_v8 = vld [vmem:[%s672_s3 + $0x18] sm:$0xff]   ;;  %v453_v10 = vld [vmem:[%s672_s3 + $0x28] sm:$0xff]   ;;  %s342_s27 = sshll.u32 %s515_s26, 4  ;;  %s343_s27 = int_to_ptr.vmem [resolvable:$true] %s342_s27 }
  0x15   :  { %395 = vmatpush3.bf16.msra.mxu0 %v446_v1  ;;  %403 = vmatpush3.bf16.msra.mxu1 %v448_v4  ;;  %v452_v9 = vld [vmem:[%s672_s3 + $0x20] sm:$0xff]   ;;  %v454_v11 = vld [vmem:[%s672_s3 + $0x30] sm:$0xff]   ;;  %v455_v12 = vld [vmem:[%s672_s3 + $0x38] sm:$0xff]   ;;  %p491_p9 = scmp.lt.s32.totalorder %s343_s27, %s343_s27 }
  0x16   :  { %396 = vmatprep.subr.bf16.mxu0 %v513_v0  ;;  %404 = vmatprep.subr.bf16.mxu1 %v513_v0  ;;  %v456_v13 = vld [vmem:[%s674_s5] sm:$0xff]   ;;  %v457_v14 = vld [vmem:[%s674_s5 + $0x8] sm:$0xff]   ;;  %v458_v15 = vld [vmem:[%s674_s5 + $0x10] sm:$0xff]  }
  0x17   :  { %v459_v16 = vld [vmem:[%s674_s5 + $0x18] sm:$0xff]   ;;  %v460_v17 = vld [vmem:[%s674_s5 + $0x20] sm:$0xff]   ;;  %v461_v18 = vld [vmem:[%s674_s5 + $0x28] sm:$0xff]  }
  0x18   :  { %v351_v19 = vld [vmem:[%s671_s2] ss:$0 sm:$0xff]  ;;  %v462_v27 = vld [vmem:[%s674_s5 + $0x30] sm:$0xff]   ;;  %v463_v28 = vld [vmem:[%s674_s5 + $0x38] sm:$0xff]  }
  0x19   :  { %397 = vmatpush3.bf16.msra.mxu0 %v447_v2  ;;  %405 = vmatpush3.bf16.msra.mxu1 %v449_v6  ;;  %v355_v29 = vld [vmem:[%s673_s4] ss:$0 sm:$0xff]  ;;  %s486_s4 = scalar_lea.vmem %s343_s27, 128 }
  0x1a   :  { %422 = vmatprep.subr.bf16.mxu0 %v513_v0  ;;  %406 = vmatprep.subr.bf16.mxu1 %v513_v0  ;;  %v364_v37 = vld [vmem:[%s675_s6] ss:$0 sm:$0xff]  ;;  %p487_p8 = scmp.ne.s32.totalorder %s343_s27, %s486_s4  ;;  %p492_p10 = scmp.lt.s32.totalorder %s486_s4, %s486_s4 }
  0x1c   :  { %399 = vmatmul.mubr.msk.bf16.vlgmr.msra.gmra.mrb[0].mxu0 %vm65_vm1, %v41_v5  ;;  %p493_p11 = por %p492_p10, %p491_p9 }
  0x1d   :  { %438 = vmatprep.mubr.msk.bf16.mxu0 %vm514_vm0, %v513_v0  ;;  %407 = vmatpush3.bf16.msra.mxu1 %v450_v7 }
  0x1e   :  { %408 = vmatprep.subr.bf16.mxu1 %v513_v0  ;;  %423 = vmatpush3.bf16.msra.mxu0 %v456_v13  ;;  %p494_p12 = pnand %p493_p11, %p487_p8 }
  0x1f   :  { %424 = vmatprep.subr.bf16.mxu0 %v513_v0 }
  0x21   :  { %409 = vmatpush3.bf16.msra.mxu1 %v451_v8 }
  0x22   :  { %410 = vmatprep.subr.bf16.mxu1 %v513_v0  ;;  %425 = vmatpush3.bf16.msra.mxu0 %v457_v14 }
  0x23   :  { %426 = vmatprep.subr.bf16.mxu0 %v513_v0 }
  0x25   :  { %411 = vmatpush3.bf16.msra.mxu1 %v452_v9 }
  0x26   :  { %412 = vmatprep.subr.bf16.mxu1 %v513_v0  ;;  %427 = vmatpush3.bf16.msra.mxu0 %v458_v15 }
  0x27   :  { %428 = vmatprep.subr.bf16.mxu0 %v513_v0 }
  0x29   :  { %413 = vmatpush3.bf16.msra.mxu1 %v453_v10 }
  0x2a   :  { %414 = vmatprep.subr.bf16.mxu1 %v513_v0  ;;  %429 = vmatpush3.bf16.msra.mxu0 %v459_v16 }
  0x2b   :  { %430 = vmatprep.subr.bf16.mxu0 %v513_v0 }
  0x2d   :  { %415 = vmatpush3.bf16.msra.mxu1 %v454_v11 }
  0x2e   :  { %416 = vmatprep.subr.bf16.mxu1 %v513_v0  ;;  %431 = vmatpush3.bf16.msra.mxu0 %v460_v17 }
  0x2f   :  { %432 = vmatprep.subr.bf16.mxu0 %v513_v0 }
  0x31   :  { %417 = vmatpush3.bf16.msra.mxu1 %v455_v12 }
  0x32   :  { %433 = vmatpush3.bf16.msra.mxu0 %v461_v18 }
  0x33   :  { %434 = vmatprep.subr.bf16.mxu0 %v513_v0 }
  0x36   :  { %435 = vmatpush3.bf16.msra.mxu0 %v462_v27 }
  0x37   :  { %436 = vmatprep.subr.bf16.mxu0 %v513_v0 }
  0x3a   :  { %437 = vmatpush3.bf16.msra.mxu0 %v463_v28 }
  0xef   :  { %v103_v20 = vpop.f32.mrb[0].mxu0 }
  0xf0   :  { %v104_v21 = vadd.f32 %v351_v19, %v103_v20  ;;  %v400_v22 = vpop.f32.mrb[1].mxu0 }
  0xf1   :  { %v106_v23 = vpop.f32.mrb[2].mxu0 }
  0xf2   :  { %v109_v24 = vmax.f32 %v104_v21, 0.0  ;;  %v401_v25 = vpop.f32.mrb[3].mxu0 }
  0xf4   :  { %v110_v26 = vpack.c.bf16 %v109_v24, %v109_v24 }
  0xf6   :  { %419 = vmatmul.mubr.bf16.vlgmr.msra.gmra.mrb[0].mxu1 %v110_v26 }
 0x1c9   :  { %v216_v30 = vpop.f32.mrb[0].mxu1 }
 0x1ca   :  { %v217_v31 = vadd.f32 %v355_v29, %v216_v30  ;;  %v420_v32 = vpop.f32.mrb[1].mxu1 }
 0x1cb   :  { %v219_v33 = vpop.f32.mrb[2].mxu1 }
 0x1cc   :  { %v222_v34 = vmax.f32 %v217_v31, 0.0  ;;  %v421_v35 = vpop.f32.mrb[3].mxu1 }
 0x1ce   :  { %v223_v36 = vpack.c.bf16 %v222_v34, %v222_v34 }
 0x1d0   :  { %439 = vmatmul.mubr.bf16.vlgmr.msra.gmra.mrb[4].mxu0 %v223_v36 }
 0x2a3   :  { %v329_v38 = vpop.f32.mrb[4].mxu0 }
 0x2a4   :  { %v330_v39 = vadd.f32 %v364_v37, %v329_v38  ;;  %v440_v40 = vpop.f32.mrb[5].mxu0 }
 0x2a5   :  { %v332_v41 = vpop.f32.mrb[6].mxu0 }
 0x2a6   :  { %335 = vst.msk [vmem:[#allocation5] sm:$0xff] %vm65_vm1, %v330_v39  ;;  %v441_v42 = vpop.f32.mrb[7].mxu0 }
 0x2a7   :  { %497 = shalt.err (!%p494_p12)
}
 0x2a8   :  { %s498_s6 = scalar_lea.hbm %s676_s7, 128 }
 0x2a9   :  { %p499_p13 = scmp.ne.s32.totalorder %s676_s7, %s498_s6  ;;  %p502_p0 = scmp.lt.u32.totalorder %s498_s6, %s676_s7 }
 0x2ab   :  { %p504_p1 = pnand %p502_p0, %p499_p13 }
 0x2ad   :  { %507 = shalt.err (!%p504_p1)
}
 0x2ae   :  { %345 = dma.vmem_to_hbm [thread:$0]  %s343_s27, 128, %s676_s7, [#allocation4]  }
 0x2af   :  { %510 = dma.done.wait [#allocation4], 128  }
 0x2b0   :  { %511 = vsyncadd [#allocation4], 4294967168 }
 0x2b1   :  { %349 = vsyncpa [#allocation3], 1 }
 0x2b2   :  { %350 = vsyncpa [#allocation4], 1 }

// kernel: tpu_custom_call.1
= control target key start
LH: loop header
LB: loop body
LE: loop exit
PB: predicated region body
PF: predicated region fallthrough
CT: control target
= control target key end

     0   :  { %12 = vsyncpa [#allocation3], 0  ;;  %s669_s0 = inlined_call_operand.hbm [shape: f32[8,32], index: 0, kind: input, shape index: {}]   ;;  %s670_s1 = inlined_call_operand.vmem [shape: bf16[32,128], index: 1, kind: input, shape index: {}]   ;;  %s671_s2 = inlined_call_operand.vmem [shape: f32[1,128], index: 2, kind: input, shape index: {}]   ;;  %s672_s3 = inlined_call_operand.vmem [shape: bf16[128,128], index: 3, kind: input, shape index: {}]   ;;  %s673_s4 = inlined_call_operand.vmem [shape: f32[1,128], index: 4, kind: input, shape index: {}]   ;;  %s674_s5 = inlined_call_operand.vmem [shape: bf16[128,32], index: 5, kind: input, shape index: {}]   ;;  %s675_s6 = inlined_call_operand.vmem [shape: f32[1,32], index: 6, kind: input, shape index: {}]   ;;  %s676_s7 = inlined_call_operand.hbm [shape: f32[8,32], index: 7, kind: output, shape index: {}]  }
   0x1   :  { %13 = vsyncpa [#allocation4], 0  ;;  %s512_s24 = smov [#allocation2]   ;;  %s464_s28 = scalar_lea.hbm %s669_s0, 128 }
   0x2   :  { %s20_s25 = sshll.u32 %s512_s24, 4  ;;  %p465_p0 = scmp.ne.s32.totalorder %s669_s0, %s464_s28  ;;  %s21_s25 = int_to_ptr.vmem [resolvable:$true] %s20_s25 }
   0x3   :  { %p468_p1 = scmp.lt.u32.totalorder %s464_s28, %s669_s0 }
   0x5   :  { %p470_p2 = pnand %p468_p1, %p465_p0 }
   0x7   :  { %473 = shalt.err (!%p470_p2)
}
   0x8   :  { %s474_s10 = scalar_lea.vmem %s21_s25, 128  ;;  %p479_p4 = scmp.lt.s32.totalorder %s21_s25, %s21_s25 }
   0x9   :  { %p475_p3 = scmp.ne.s32.totalorder %s21_s25, %s474_s10  ;;  %p480_p5 = scmp.lt.s32.totalorder %s474_s10, %s474_s10 }
   0xb   :  { %p481_p6 = por %p480_p5, %p479_p4 }
   0xd   :  { %p482_p7 = pnand %p481_p6, %p475_p3 }
   0xf   :  { %485 = shalt.err (!%p482_p7)
}
  0x10   :  { %23 = dma.hbm_to_vmem [thread:$0]  %s669_s0, 128, %s21_s25, [#allocation3]  }
  0x11   :  { %508 = dma.done.wait [#allocation3], 128  }
  0x12   :  { %509 = vsyncadd [#allocation3], 4294967168  ;;  %v513_v0 = vmov 0.0   ;;  %vm514_vm0 = vmmov 0   ;;  %v446_v1 = vld [vmem:[%s670_s1] sm:$0xff]   ;;  %v447_v2 = vld [vmem:[%s670_s1 + $0x8] sm:$0xff]  }
  0x13   :  { %394 = vmatprep.subr.bf16.mxu0 %v513_v0  ;;  %398 = vmatprep.mubr.msk.bf16.mxu0 %vm514_vm0, %v513_v0  ;;  %v40_v3 = vld [vmem:[#allocation2] sm:$0xff]  ;;  %v449_v6 = vld [vmem:[%s672_s3 + $0x8] sm:$0xff]   ;;  %vm65_vm1 = vcmask 261120   ;;  %v450_v7 = vld [vmem:[%s672_s3 + $0x10] sm:$0xff]   ;;  %s515_s26 = smov [#allocation5]  }
  0x14   :  { %402 = vmatprep.subr.bf16.mxu1 %v513_v0  ;;  %418 = vmatprep.mubr.msk.bf16.mxu1 %vm514_vm0, %v513_v0  ;;  %v448_v4 = vld [vmem:[%s672_s3] sm:$0xff]   ;;  %v41_v5 = vpack.c.bf16 %v40_v3, %v40_v3  ;;  %v451_v8 = vld [vmem:[%s672_s3 + $0x18] sm:$0xff]   ;;  %v453_v10 = vld [vmem:[%s672_s3 + $0x28] sm:$0xff]   ;;  %s342_s27 = sshll.u32 %s515_s26, 4  ;;  %s343_s27 = int_to_ptr.vmem [resolvable:$true] %s342_s27 }
  0x15   :  { %395 = vmatpush3.bf16.msra.mxu0 %v446_v1  ;;  %403 = vmatpush3.bf16.msra.mxu1 %v448_v4  ;;  %v452_v9 = vld [vmem:[%s672_s3 + $0x20] sm:$0xff]   ;;  %v454_v11 = vld [vmem:[%s672_s3 + $0x30] sm:$0xff]   ;;  %v455_v12 = vld [vmem:[%s672_s3 + $0x38] sm:$0xff]   ;;  %p491_p9 = scmp.lt.s32.totalorder %s343_s27, %s343_s27 }
  0x16   :  { %396 = vmatprep.subr.bf16.mxu0 %v513_v0  ;;  %404 = vmatprep.subr.bf16.mxu1 %v513_v0  ;;  %v456_v13 = vld [vmem:[%s674_s5] sm:$0xff]   ;;  %v457_v14 = vld [vmem:[%s674_s5 + $0x8] sm:$0xff]   ;;  %v458_v15 = vld [vmem:[%s674_s5 + $0x10] sm:$0xff]  }
  0x17   :  { %v459_v16 = vld [vmem:[%s674_s5 + $0x18] sm:$0xff]   ;;  %v460_v17 = vld [vmem:[%s674_s5 + $0x20] sm:$0xff]   ;;  %v461_v18 = vld [vmem:[%s674_s5 + $0x28] sm:$0xff]  }
  0x18   :  { %v351_v19 = vld [vmem:[%s671_s2] ss:$0 sm:$0xff]  ;;  %v462_v27 = vld [vmem:[%s674_s5 + $0x30] sm:$0xff]   ;;  %v463_v28 = vld [vmem:[%s674_s5 + $0x38] sm:$0xff]  }
  0x19   :  { %397 = vmatpush3.bf16.msra.mxu0 %v447_v2  ;;  %405 = vmatpush3.bf16.msra.mxu1 %v449_v6  ;;  %v355_v29 = vld [vmem:[%s673_s4] ss:$0 sm:$0xff]  ;;  %s486_s4 = scalar_lea.vmem %s343_s27, 128 }
  0x1a   :  { %422 = vmatprep.subr.bf16.mxu0 %v513_v0  ;;  %406 = vmatprep.subr.bf16.mxu1 %v513_v0  ;;  %v364_v37 = vld [vmem:[%s675_s6] ss:$0 sm:$0xff]  ;;  %p487_p8 = scmp.ne.s32.totalorder %s343_s27, %s486_s4  ;;  %p492_p10 = scmp.lt.s32.totalorder %s486_s4, %s486_s4 }
  0x1c   :  { %399 = vmatmul.mubr.msk.bf16.vlgmr.msra.gmra.mrb[0].mxu0 %vm65_vm1, %v41_v5  ;;  %p493_p11 = por %p492_p10, %p491_p9 }
  0x1d   :  { %438 = vmatprep.mubr.msk.bf16.mxu0 %vm514_vm0, %v513_v0  ;;  %407 = vmatpush3.bf16.msra.mxu1 %v450_v7 }
  0x1e   :  { %408 = vmatprep.subr.bf16.mxu1 %v513_v0  ;;  %423 = vmatpush3.bf16.msra.mxu0 %v456_v13  ;;  %p494_p12 = pnand %p493_p11, %p487_p8 }
  0x1f   :  { %424 = vmatprep.subr.bf16.mxu0 %v513_v0 }
  0x21   :  { %409 = vmatpush3.bf16.msra.mxu1 %v451_v8 }
  0x22   :  { %410 = vmatprep.subr.bf16.mxu1 %v513_v0  ;;  %425 = vmatpush3.bf16.msra.mxu0 %v457_v14 }
  0x23   :  { %426 = vmatprep.subr.bf16.mxu0 %v513_v0 }
  0x25   :  { %411 = vmatpush3.bf16.msra.mxu1 %v452_v9 }
  0x26   :  { %412 = vmatprep.subr.bf16.mxu1 %v513_v0  ;;  %427 = vmatpush3.bf16.msra.mxu0 %v458_v15 }
  0x27   :  { %428 = vmatprep.subr.bf16.mxu0 %v513_v0 }
  0x29   :  { %413 = vmatpush3.bf16.msra.mxu1 %v453_v10 }
  0x2a   :  { %414 = vmatprep.subr.bf16.mxu1 %v513_v0  ;;  %429 = vmatpush3.bf16.msra.mxu0 %v459_v16 }
  0x2b   :  { %430 = vmatprep.subr.bf16.mxu0 %v513_v0 }
  0x2d   :  { %415 = vmatpush3.bf16.msra.mxu1 %v454_v11 }
  0x2e   :  { %416 = vmatprep.subr.bf16.mxu1 %v513_v0  ;;  %431 = vmatpush3.bf16.msra.mxu0 %v460_v17 }
  0x2f   :  { %432 = vmatprep.subr.bf16.mxu0 %v513_v0 }
  0x31   :  { %417 = vmatpush3.bf16.msra.mxu1 %v455_v12 }
  0x32   :  { %433 = vmatpush3.bf16.msra.mxu0 %v461_v18 }
  0x33   :  { %434 = vmatprep.subr.bf16.mxu0 %v513_v0 }
  0x36   :  { %435 = vmatpush3.bf16.msra.mxu0 %v462_v27 }
  0x37   :  { %436 = vmatprep.subr.bf16.mxu0 %v513_v0 }
  0x3a   :  { %437 = vmatpush3.bf16.msra.mxu0 %v463_v28 }
  0xef   :  { %v103_v20 = vpop.f32.mrb[0].mxu0 }
  0xf0   :  { %v104_v21 = vadd.f32 %v351_v19, %v103_v20  ;;  %v400_v22 = vpop.f32.mrb[1].mxu0 }
  0xf1   :  { %v106_v23 = vpop.f32.mrb[2].mxu0 }
  0xf2   :  { %v109_v24 = vmax.f32 %v104_v21, 0.0  ;;  %v401_v25 = vpop.f32.mrb[3].mxu0 }
  0xf4   :  { %v110_v26 = vpack.c.bf16 %v109_v24, %v109_v24 }
  0xf6   :  { %419 = vmatmul.mubr.bf16.vlgmr.msra.gmra.mrb[0].mxu1 %v110_v26 }
 0x1c9   :  { %v216_v30 = vpop.f32.mrb[0].mxu1 }
 0x1ca   :  { %v217_v31 = vadd.f32 %v355_v29, %v216_v30  ;;  %v420_v32 = vpop.f32.mrb[1].mxu1 }
 0x1cb   :  { %v219_v33 = vpop.f32.mrb[2].mxu1 }
 0x1cc   :  { %v222_v34 = vmax.f32 %v217_v31, 0.0  ;;  %v421_v35 = vpop.f32.mrb[3].mxu1 }
 0x1ce   :  { %v223_v36 = vpack.c.bf16 %v222_v34, %v222_v34 }
 0x1d0   :  { %439 = vmatmul.mubr.bf16.vlgmr.msra.gmra.mrb[4].mxu0 %v223_v36 }
 0x2a3   :  { %v329_v38 = vpop.f32.mrb[4].mxu0 }
 0x2a4   :  { %v330_v39 = vadd.f32 %v364_v37, %v329_v38  ;;  %v440_v40 = vpop.f32.mrb[5].mxu0 }
 0x2a5   :  { %v332_v41 = vpop.f32.mrb[6].mxu0 }
 0x2a6   :  { %335 = vst.msk [vmem:[#allocation5] sm:$0xff] %vm65_vm1, %v330_v39  ;;  %v441_v42 = vpop.f32.mrb[7].mxu0 }
 0x2a7   :  { %497 = shalt.err (!%p494_p12)
}
 0x2a8   :  { %s498_s6 = scalar_lea.hbm %s676_s7, 128 }
 0x2a9   :  { %p499_p13 = scmp.ne.s32.totalorder %s676_s7, %s498_s6  ;;  %p502_p0 = scmp.lt.u32.totalorder %s498_s6, %s676_s7 }
 0x2ab   :  { %p504_p1 = pnand %p502_p0, %p499_p13 }
 0x2ad   :  { %507 = shalt.err (!%p504_p1)
}
 0x2ae   :  { %345 = dma.vmem_to_hbm [thread:$0]  %s343_s27, 128, %s676_s7, [#allocation4]  }
 0x2af   :  { %510 = dma.done.wait [#allocation4], 128  }
 0x2b0   :  { %511 = vsyncadd [#allocation4], 4294967168 }
 0x2b1   :  { %349 = vsyncpa [#allocation3], 1 }
 0x2b2   :  { %350 = vsyncpa [#allocation4], 1 }

</bundles_post_ra>
